<compile_context>
chip_gen: v7x
topology: tpu7x:2x2x1
jax: 0.10.0
libtpu: 0.0.40
codegen_flags: <defaults>
</compile_context>

<pallas_src>
import jax
import jax.numpy as jnp
from jax.experimental import pallas as pl
from jax.experimental.pallas import tpu as pltpu


def identity(x: jax.Array) -> jax.Array:
    """True identity forward pass (matches torch.nn.Identity).

    No kernel, no HBM read/write — returning the input unchanged is the
    fastest correct implementation on every TPU generation.
    """
    return x


_MAX_DMA_CHUNKS = 4  # a handful of in-flight DMAs is plenty for a memcpy


def _make_dma_copy_kernel(chunks):
    """Kernel factory: HBM->HBM copy of the whole ref, optionally chunked.

    `chunks` is either None (single full-ref DMA) or a static list of
    (start, size) ranges along axis 0, each driven by its own DMA semaphore.
    """
    if chunks is None:

        def kernel(x_hbm, o_hbm, sem):
            cp = pltpu.make_async_copy(x_hbm, o_hbm, sem)
            cp.start()
            cp.wait()

        return kernel

    def kernel(x_hbm, o_hbm, sems):
        cps = []
        for i, (start, size) in enumerate(chunks):
            cp = pltpu.make_async_copy(
                x_hbm.at[pl.ds(start, size)],
                o_hbm.at[pl.ds(start, size)],
                sems.at[i],
            )
            cp.start()
            cps.append(cp)
        for cp in cps:
            cp.wait()

    return kernel


def identity_copy(x: jax.Array, *, chunk_bytes: int = 8 * 1024 * 1024) -> jax.Array:
    """Identity that materializes a fresh output buffer via a Pallas DMA copy.

    Purely DMA-engine bound (one HBM read + one HBM write), works on any
    shape / dtype without padding or relayout.
    """
    if x.size == 0:
        # Fresh (empty) buffer, consistent with the docstring.
        return jnp.copy(x)

    itemsize = jnp.dtype(x.dtype).itemsize
    nbytes = x.size * itemsize

    if x.ndim == 0 or x.shape[0] < 2:
        chunks = None
        scratch = [pltpu.SemaphoreType.DMA]
    else:
        num_chunks = int(
            min(x.shape[0], _MAX_DMA_CHUNKS, max(1, nbytes // max(1, chunk_bytes)))
        )
        d0 = x.shape[0]
        base, rem = divmod(d0, num_chunks)
        chunks, start = [], 0
        for i in range(num_chunks):
            size = base + (1 if i < rem else 0)
            chunks.append((start, size))
            start += size
        scratch = [pltpu.SemaphoreType.DMA((num_chunks,))]

    return pl.pallas_call(
        _make_dma_copy_kernel(chunks),
        out_shape=jax.ShapeDtypeStruct(x.shape, x.dtype),
        in_specs=[pl.BlockSpec(memory_space=pl.ANY)],
        out_specs=pl.BlockSpec(memory_space=pl.ANY),
        scratch_shapes=scratch,
        compiler_params=pltpu.CompilerParams(has_side_effects=True),
        cost_estimate=pl.CostEstimate(
            flops=0, transcendentals=0, bytes_accessed=2 * nbytes
        ),
    )(x)


if __name__ == "__main__":
    key = jax.random.PRNGKey(0)
    # Small NCHW input consistent with the module's forward (any tensor).
    x = jax.random.normal(key, (2, 4, 16, 16), dtype=jnp.float32)

    # Fast path: zero-cost pass-through (the recommended identity).
    y = jax.block_until_ready(identity(x))
    assert y.shape == x.shape and y.dtype == x.dtype
    assert bool(jnp.all(y == x))

    # Pallas HBM->HBM DMA copy on the same input.
    y2 = jax.block_until_ready(identity_copy(x))
    assert y2.shape == x.shape and y2.dtype == x.dtype
    assert bool(jnp.all(y2 == x))

    # Ragged shape + tiny chunk_bytes to exercise the multi-chunk DMA path
    # (no padding / trailing slice needed anywhere).
    x3 = jax.random.normal(jax.random.PRNGKey(1), (3, 33, 130), dtype=jnp.float32)
    y3 = jax.block_until_ready(identity_copy(x3, chunk_bytes=16 * 1024))
    assert y3.shape == x3.shape and y3.dtype == x3.dtype
    assert bool(jnp.all(y3 == x3))

    print("KERNEL_OK")
</pallas_src>

<mosaic_0001>
module attributes {stable_mosaic.version = 11 : i64} {
  func.func @kernel(%arg0: memref<2x4x16x16xf32, #tpu.memory_space<any>>, %arg1: memref<2x4x16x16xf32, #tpu.memory_space<any>>, %arg2: memref<1x!tpu.dma_semaphore, #tpu.memory_space<semaphore_mem>>) attributes {dimension_semantics = [], scalar_prefetch = 0 : i64, scratch_operands = 1 : i64, tpu.core_type = #tpu.core_type<tc>} {
    %c0_i32 = arith.constant 0 : i32
    %c0_i32_0 = arith.constant 0 : i32
    %c0_i32_1 = arith.constant 0 : i32
    %c0_i32_2 = arith.constant 0 : i32
    %c0_i32_3 = arith.constant 0 : i32
    %0 = tpu.memref_slice %arg0[%c0_i32_0, %c0_i32_1, %c0_i32_2, %c0_i32_3] : memref<2x4x16x16xf32, #tpu.memory_space<any>> -> memref<2x4x16x16xf32, #tpu.memory_space<any>>
    %c0_i32_4 = arith.constant 0 : i32
    %c0_i32_5 = arith.constant 0 : i32
    %c0_i32_6 = arith.constant 0 : i32
    %c0_i32_7 = arith.constant 0 : i32
    %1 = tpu.memref_slice %arg1[%c0_i32_4, %c0_i32_5, %c0_i32_6, %c0_i32_7] : memref<2x4x16x16xf32, #tpu.memory_space<any>> -> memref<2x4x16x16xf32, #tpu.memory_space<any>>
    %2 = tpu.memref_slice %arg2[%c0_i32] : memref<1x!tpu.dma_semaphore, #tpu.memory_space<semaphore_mem>> -> memref<1x!tpu.dma_semaphore, #tpu.memory_space<semaphore_mem>>
    %3 = tpu.memref_squeeze %2 : memref<1x!tpu.dma_semaphore, #tpu.memory_space<semaphore_mem>> -> memref<!tpu.dma_semaphore, #tpu.memory_space<semaphore_mem>>
    tpu.enqueue_dma source(%0 : memref<2x4x16x16xf32, #tpu.memory_space<any>>) target(%1 : memref<2x4x16x16xf32, #tpu.memory_space<any>>) target_semaphore(%3 : memref<!tpu.dma_semaphore, #tpu.memory_space<semaphore_mem>>)
    %c0_i32_8 = arith.constant 0 : i32
    %c0_i32_9 = arith.constant 0 : i32
    %c0_i32_10 = arith.constant 0 : i32
    %c0_i32_11 = arith.constant 0 : i32
    %c0_i32_12 = arith.constant 0 : i32
    %4 = tpu.memref_slice %arg0[%c0_i32_9, %c0_i32_10, %c0_i32_11, %c0_i32_12] : memref<2x4x16x16xf32, #tpu.memory_space<any>> -> memref<2x4x16x16xf32, #tpu.memory_space<any>>
    %c0_i32_13 = arith.constant 0 : i32
    %c0_i32_14 = arith.constant 0 : i32
    %c0_i32_15 = arith.constant 0 : i32
    %c0_i32_16 = arith.constant 0 : i32
    %5 = tpu.memref_slice %arg1[%c0_i32_13, %c0_i32_14, %c0_i32_15, %c0_i32_16] : memref<2x4x16x16xf32, #tpu.memory_space<any>> -> memref<2x4x16x16xf32, #tpu.memory_space<any>>
    %6 = tpu.memref_slice %arg2[%c0_i32_8] : memref<1x!tpu.dma_semaphore, #tpu.memory_space<semaphore_mem>> -> memref<1x!tpu.dma_semaphore, #tpu.memory_space<semaphore_mem>>
    %7 = tpu.memref_squeeze %6 : memref<1x!tpu.dma_semaphore, #tpu.memory_space<semaphore_mem>> -> memref<!tpu.dma_semaphore, #tpu.memory_space<semaphore_mem>>
    tpu.wait_dma2 semaphore(%7 : memref<!tpu.dma_semaphore, #tpu.memory_space<semaphore_mem>>) src(%4 : memref<2x4x16x16xf32, #tpu.memory_space<any>>) dst(%5 : memref<2x4x16x16xf32, #tpu.memory_space<any>>)
    return
  }
}

</mosaic_0001>

<bundles_post_ra>
// kernel: tpu_custom_call.1
= control target key start
LH: loop header
LB: loop body
LE: loop exit
PB: predicated region body
PF: predicated region fallthrough
CT: control target
= control target key end

     0   :  { %s36_s6 = smov [#allocation2]   ;;  %s37_s7 = smov [#allocation3]   ;;  %s55_s0 = inlined_call_operand.hbm [shape: f32[2,4,16,16], index: 0, kind: input, shape index: {}]   ;;  %s56_s1 = inlined_call_operand.hbm [shape: f32[2,4,16,16], index: 1, kind: output, shape index: {}]  }
   0x1   :  { %s38_s8 = smov 0  }
   0x2   :  { %18 = dma.general %s55_s0, 2048, %s56_s1, %s36_s6, %s37_s7, [#allocation4], %s38_s8, 0  }
   0x3   :  { %34 = dma.done.wait [#allocation2], 2048 }
   0x4   :  { %35 = vsyncadd [#allocation2], 4294965248 }
   0x5   :  { %24 = vsyncmov [#allocation2] }
   0x8   :  { %s25_s13 = vpop.sfrf %24 }
   0x9   :  { %p30_p0 = scmp.ne.s32.totalorder %s25_s13, 0 }
   0xb   :  { %29 = shalt.err (%p30_p0)  }

</bundles_post_ra>
